<compile_context>
chip_gen: v6e
topology: v6e:2x2x1
jax: 0.10.0
libtpu: 0.0.40
codegen_flags: <defaults>
</compile_context>

<pallas_src>
import functools

import jax
import jax.numpy as jnp
from jax.experimental import pallas as pl
from jax.experimental.pallas import tpu as pltpu

# Explicit scoped-VMEM budget (default is only 16/32 MiB on v5e/v6e; keep <= v7x's 64 MiB).
VMEM_LIMIT_BYTES = 64 * 1024 * 1024


def _vmem_spec():
    # Whole array resident in VMEM, no blocking / no double buffering (constant weights).
    return pl.BlockSpec(memory_space=pltpu.MemorySpace.VMEM)


# ---------------------------------------------------------------------------
# In-kernel helpers (f32)
# ---------------------------------------------------------------------------
def _layer_norm(x, gamma, beta, eps=1e-12):
    mean = jnp.mean(x, axis=-1, keepdims=True)
    var = jnp.mean((x - mean) ** 2, axis=-1, keepdims=True)
    return (x - mean) * jax.lax.rsqrt(var + eps) * gamma + beta


def _pick_batch_tile(batch, seq, max_rows=256):
    """Largest divisor of `batch` such that the flattened row count stays MXU-friendly."""
    best = 1
    for d in range(1, batch + 1):
        if batch % d == 0 and d * seq <= max_rows:
            best = d
    return best


# ---------------------------------------------------------------------------
# Kernel: embedding LayerNorm
# ---------------------------------------------------------------------------
def embed_ln_kernel(x_ref, g_ref, b_ref, o_ref):
    o_ref[...] = _layer_norm(x_ref[...], g_ref[...], b_ref[...])


def embed_ln(x, gamma, beta, bt):
    B, S, H = x.shape
    return pl.pallas_call(
        embed_ln_kernel,
        out_shape=jax.ShapeDtypeStruct((B, S, H), jnp.float32),
        grid=(B // bt,),
        in_specs=[
            pl.BlockSpec((bt, S, H), lambda b: (b, 0, 0)),
            _vmem_spec(),
            _vmem_spec(),
        ],
        out_specs=pl.BlockSpec((bt, S, H), lambda b: (b, 0, 0)),
        compiler_params=pltpu.CompilerParams(
            dimension_semantics=("parallel",),
            vmem_limit_bytes=VMEM_LIMIT_BYTES),
    )(x, gamma, beta)


# ---------------------------------------------------------------------------
# Transformer encoder layer core (shared by both layer kernels)
# ---------------------------------------------------------------------------
def _encoder_core(x3, bias_h, wqkv, bqkv, wo, bo, g1, be1, w1, b1, w2, b2,
                  g2, be2, *, num_heads, head_dim):
    bt, S, H = x3.shape
    x = x3.reshape(bt * S, H)                       # [R, H] f32, R = bt*S
    xb = x.astype(jnp.bfloat16)

    # Fused QKV projection: one large MXU pass, f32 accumulation.
    qkv = jnp.dot(xb, wqkv, preferred_element_type=jnp.float32) + bqkv   # [R, 3H]
    q = qkv[:, :H]
    k = qkv[:, H:2 * H]
    v = qkv[:, 2 * H:]

    def split_heads(t):                              # [R, H] -> [bt*nH, S, hd]
        t = t.reshape(bt, S, num_heads, head_dim)
        t = jnp.transpose(t, (0, 2, 1, 3))
        return t.reshape(bt * num_heads, S, head_dim)

    qh = split_heads(q).astype(jnp.bfloat16)
    kh = split_heads(k).astype(jnp.bfloat16)
    vh = split_heads(v).astype(jnp.bfloat16)

    scale = 1.0 / (head_dim ** 0.5)
    # Scores + softmax kept in f32 (avoid bf16 saturation with the -1e4 mask bias).
    s = jnp.einsum('bqd,bkd->bqk', qh, kh,
                   preferred_element_type=jnp.float32)                   # [bt*nH, S, S]
    s = s * scale + bias_h                                               # bias_h: [bt*nH, 1, S]
    s = s - jnp.max(s, axis=-1, keepdims=True)
    p = jnp.exp(s)
    p = p * pl.reciprocal(jnp.sum(p, axis=-1, keepdims=True), approx=True)

    ctx = jnp.einsum('bqk,bkd->bqd', p.astype(jnp.bfloat16), vh,
                     preferred_element_type=jnp.float32)                 # [bt*nH, S, hd]
    ctx = ctx.reshape(bt, num_heads, S, head_dim)
    ctx = jnp.transpose(ctx, (0, 2, 1, 3)).reshape(bt * S, H)

    attn = jnp.dot(ctx.astype(jnp.bfloat16), wo,
                   preferred_element_type=jnp.float32) + bo
    h1 = _layer_norm(x + attn, g1, be1)

    # TODO(synk): PyTorch/HF BERT default GELU is exact erf; tanh approximation kept
    # here (EUP-friendly lowering) -> small numerical divergence from the reference.
    ff = jnp.dot(h1.astype(jnp.bfloat16), w1,
                 preferred_element_type=jnp.float32) + b1
    ff = jax.nn.gelu(ff, approximate=True)
    ff = jnp.dot(ff.astype(jnp.bfloat16), w2,
                 preferred_element_type=jnp.float32) + b2
    h2 = _layer_norm(h1 + ff, g2, be2)
    return h2                                        # [bt*S, H] f32


def encoder_layer_kernel(x_ref, bias_ref,
                         wqkv_ref, bqkv_ref, wo_ref, bo_ref,
                         g1_ref, be1_ref, w1_ref, b1_ref, w2_ref, b2_ref,
                         g2_ref, be2_ref, o_ref, *, num_heads, head_dim):
    bt, S, H = x_ref.shape
    h2 = _encoder_core(x_ref[...], bias_ref[...],
                       wqkv_ref[...], bqkv_ref[...], wo_ref[...], bo_ref[...],
                       g1_ref[...], be1_ref[...], w1_ref[...], b1_ref[...],
                       w2_ref[...], b2_ref[...], g2_ref[...], be2_ref[...],
                       num_heads=num_heads, head_dim=head_dim)
    o_ref[...] = h2.reshape(bt, S, H)


def encoder_layer_pooler_kernel(x_ref, bias_ref,
                                wqkv_ref, bqkv_ref, wo_ref, bo_ref,
                                g1_ref, be1_ref, w1_ref, b1_ref, w2_ref, b2_ref,
                                g2_ref, be2_ref, wp_ref, bp_ref,
                                o_ref, pool_ref, *, num_heads, head_dim):
    # Last encoder layer with the BERT pooler (CLS -> dense -> tanh) fused as epilogue.
    bt, S, H = x_ref.shape
    h2 = _encoder_core(x_ref[...], bias_ref[...],
                       wqkv_ref[...], bqkv_ref[...], wo_ref[...], bo_ref[...],
                       g1_ref[...], be1_ref[...], w1_ref[...], b1_ref[...],
                       w2_ref[...], b2_ref[...], g2_ref[...], be2_ref[...],
                       num_heads=num_heads, head_dim=head_dim)
    o3 = h2.reshape(bt, S, H)
    o_ref[...] = o3
    cls = o3[:, 0, :]                                # [bt, H]
    pooled = jnp.tanh(
        jnp.dot(cls.astype(jnp.bfloat16), wp_ref[...],
                preferred_element_type=jnp.float32) + bp_ref[...])
    pool_ref[...] = pooled.reshape(bt, 1, H)


def encoder_layer(x, bias_h, lw, num_heads, head_dim, bt,
                  pooler_w=None, pooler_b=None):
    B, S, H = x.shape
    grid = (B // bt,)
    x_in_spec = pl.BlockSpec((bt, S, H), lambda b: (b, 0, 0))
    x_out_spec = pl.BlockSpec((bt, S, H), lambda b: (b, 0, 0))
    bias_spec = pl.BlockSpec((bt * num_heads, 1, S), lambda b: (b, 0, 0))
    weight_specs = [_vmem_spec() for _ in range(12)]
    in_specs = [x_in_spec, bias_spec] + weight_specs
    args = (x, bias_h,
            lw['wqkv'], lw['bqkv'], lw['wo'], lw['bo'],
            lw['ln1_g'], lw['ln1_b'], lw['w1'], lw['b1'],
            lw['w2'], lw['b2'], lw['ln2_g'], lw['ln2_b'])
    cp = pltpu.CompilerParams(dimension_semantics=("parallel",),
                              vmem_limit_bytes=VMEM_LIMIT_BYTES)

    if pooler_w is None:
        kernel = functools.partial(encoder_layer_kernel,
                                   num_heads=num_heads, head_dim=head_dim)
        return pl.pallas_call(
            kernel,
            out_shape=jax.ShapeDtypeStruct((B, S, H), jnp.float32),
            grid=grid,
            in_specs=in_specs,
            out_specs=x_out_spec,
            compiler_params=cp,
        )(*args)

    kernel = functools.partial(encoder_layer_pooler_kernel,
                               num_heads=num_heads, head_dim=head_dim)
    out, pooled = pl.pallas_call(
        kernel,
        out_shape=(jax.ShapeDtypeStruct((B, S, H), jnp.float32),
                   jax.ShapeDtypeStruct((B, 1, H), jnp.float32)),
        grid=grid,
        in_specs=in_specs + [_vmem_spec(), _vmem_spec()],
        out_specs=(x_out_spec, pl.BlockSpec((bt, 1, H), lambda b: (b, 0, 0))),
        compiler_params=cp,
    )(*args, pooler_w, pooler_b)
    return out, pooled[:, 0, :]


# ---------------------------------------------------------------------------
# BERT encoder (glue: embedding gathers in plain JAX; hot path in Pallas)
# ---------------------------------------------------------------------------
def bert_encode(params, input_ids, token_type_ids, attention_mask):
    B, S = input_ids.shape
    nH = params['num_heads']
    word = jnp.take(params['word_emb'], input_ids, axis=0)        # [B, S, H]
    pos = params['pos_emb'][:S][None, :, :]                       # [1, S, H]
    seg = jnp.take(params['type_emb'], token_type_ids, axis=0)    # [B, S, H]
    x = (word + pos + seg).astype(jnp.float32)

    bt = _pick_batch_tile(B, S)
    x = embed_ln(x, params['emb_ln_g'], params['emb_ln_b'], bt)

    # Additive attention bias, computed once and expanded per head: [B*nH, 1, S].
    bias = (1.0 - attention_mask.astype(jnp.float32)) * (-10000.0)   # [B, S]
    bias_h = jnp.broadcast_to(bias[:, None, None, :], (B, nH, 1, S))
    bias_h = bias_h.reshape(B * nH, 1, S)

    pooled = None
    n_layers = len(params['layers'])
    for li, lw in enumerate(params['layers']):
        if li == n_layers - 1:
            x, pooled = encoder_layer(x, bias_h, lw, nH, params['head_dim'], bt,
                                      pooler_w=params['pooler_w'],
                                      pooler_b=params['pooler_b'])
        else:
            x = encoder_layer(x, bias_h, lw, nH, params['head_dim'], bt)
    return x, pooled


# ---------------------------------------------------------------------------
# SimCSE BERT wrapper (mirrors the PyTorch module forward)
# ---------------------------------------------------------------------------
def gen_attention_mask(token_ids, valid_length):
    S = token_ids.shape[1]
    return (jnp.arange(S)[None, :] < valid_length[:, None]).astype(jnp.float32)


def simcse_bert_forward(params, inputs, mode):
    names = ('anchor', 'positive', 'negative') if mode == 'train' else \
            ('sentence_1', 'sentence_2')
    srcs = [inputs[n]['source'] for n in names]
    segs = [inputs[n]['segment_ids'] for n in names]
    masks = [gen_attention_mask(inputs[n]['source'], inputs[n]['valid_length'])
             for n in names]
    B = srcs[0].shape[0]
    # Concatenate branches into one batch -> each layer's weights are DMA'd once.
    src = jnp.concatenate(srcs, axis=0)
    seg = jnp.concatenate(segs, axis=0)
    am = jnp.concatenate(masks, axis=0)
    _, pooled = bert_encode(params, src, seg, am)
    return tuple(pooled[i * B:(i + 1) * B] for i in range(len(names)))


# ---------------------------------------------------------------------------
# Deterministic synthetic parameter init (bf16 matmul weights, f32 everything else)
# ---------------------------------------------------------------------------
def init_params(key, vocab, hidden, num_layers, num_heads, intermediate,
                max_pos, type_vocab):
    def nrm(k, shape, scale=0.02, dtype=jnp.float32):
        return (scale * jax.random.normal(k, shape)).astype(dtype)

    keys = iter(jax.random.split(key, 8 + 8 * num_layers))
    params = {
        'num_heads': num_heads,
        'head_dim': hidden // num_heads,
        'word_emb': nrm(next(keys), (vocab, hidden)),
        'pos_emb': nrm(next(keys), (max_pos, hidden)),
        'type_emb': nrm(next(keys), (type_vocab, hidden)),
        'emb_ln_g': jnp.ones((1, hidden), jnp.float32),
        'emb_ln_b': jnp.zeros((1, hidden), jnp.float32),
        'pooler_w': nrm(next(keys), (hidden, hidden), dtype=jnp.bfloat16),
        'pooler_b': jnp.zeros((1, hidden), jnp.float32),
        'layers': [],
    }
    for _ in range(num_layers):
        lw = {
            'wqkv': nrm(next(keys), (hidden, 3 * hidden), dtype=jnp.bfloat16),
            'bqkv': jnp.zeros((1, 3 * hidden), jnp.float32),
            'wo': nrm(next(keys), (hidden, hidden), dtype=jnp.bfloat16),
            'bo': jnp.zeros((1, hidden), jnp.float32),
            'ln1_g': jnp.ones((1, hidden), jnp.float32),
            'ln1_b': jnp.zeros((1, hidden), jnp.float32),
            'w1': nrm(next(keys), (hidden, intermediate), dtype=jnp.bfloat16),
            'b1': jnp.zeros((1, intermediate), jnp.float32),
            'w2': nrm(next(keys), (intermediate, hidden), dtype=jnp.bfloat16),
            'b2': jnp.zeros((1, hidden), jnp.float32),
            'ln2_g': jnp.ones((1, hidden), jnp.float32),
            'ln2_b': jnp.zeros((1, hidden), jnp.float32),
        }
        params['layers'].append(lw)
    return params


# ---------------------------------------------------------------------------
if __name__ == "__main__":
    B, S = 2, 16
    HIDDEN, HEADS, INTER, LAYERS = 128, 4, 256, 2
    VOCAB, TYPE_VOCAB, MAX_POS = 100, 2, 64

    root = jax.random.PRNGKey(0)
    pkey, ikey = jax.random.split(root)
    params = init_params(pkey, VOCAB, HIDDEN, LAYERS, HEADS, INTER,
                         MAX_POS, TYPE_VOCAB)

    def make_branch(k):
        src = jax.random.randint(k, (B, S), 0, VOCAB, dtype=jnp.int32)
        seg = jnp.zeros((B, S), jnp.int32)
        vlen = jnp.array([S, S // 2], jnp.int32)
        return {'source': src, 'segment_ids': seg, 'valid_length': vlen}

    k1, k2, k3 = jax.random.split(ikey, 3)
    inputs = {
        'anchor': make_branch(k1),
        'positive': make_branch(k2),
        'negative': make_branch(k3),
    }

    anchor_p, positive_p, negative_p = simcse_bert_forward(params, inputs, 'train')
    jax.block_until_ready((anchor_p, positive_p, negative_p))

    assert anchor_p.shape == (B, HIDDEN)
    assert positive_p.shape == (B, HIDDEN)
    assert negative_p.shape == (B, HIDDEN)
    print("KERNEL_OK")
</pallas_src>

<mosaic_0001>
module attributes {stable_mosaic.version = 11 : i64} {
  func.func @embed_ln_kernel(%arg0: i32, %arg1: memref<6x16x128xf32, #tpu.memory_space<vmem>>, %arg2: memref<1x128xf32, #tpu.memory_space<vmem>>, %arg3: memref<1x128xf32, #tpu.memory_space<vmem>>, %arg4: memref<6x16x128xf32, #tpu.memory_space<vmem>>) attributes {dimension_semantics = [#tpu.dimension_semantics<parallel>], iteration_bounds = array<i64: 1>, scalar_prefetch = 0 : i64, scratch_operands = 0 : i64, tpu.core_type = #tpu.core_type<tc>, window_params = [{transform_indices = @transform_0, window_bounds = array<i64: 6, 16, 128>}, {pipeline_mode = #tpu.pipeline_mode<synchronous>, transform_indices = @transform_1, window_bounds = array<i64: 1, 128>}, {pipeline_mode = #tpu.pipeline_mode<synchronous>, transform_indices = @transform_2, window_bounds = array<i64: 1, 128>}, {transform_indices = @transform_3, window_bounds = array<i64: 6, 16, 128>}]} {
    %c0 = arith.constant 0 : index
    %c0_0 = arith.constant 0 : index
    %c0_1 = arith.constant 0 : index
    %0 = vector.load %arg1[%c0, %c0_0, %c0_1] : memref<6x16x128xf32, #tpu.memory_space<vmem>>, vector<6x16x128xf32>
    %c0_2 = arith.constant 0 : index
    %c0_3 = arith.constant 0 : index
    %1 = vector.load %arg2[%c0_2, %c0_3] : memref<1x128xf32, #tpu.memory_space<vmem>>, vector<1x128xf32>
    %c0_4 = arith.constant 0 : index
    %c0_5 = arith.constant 0 : index
    %2 = vector.load %arg3[%c0_4, %c0_5] : memref<1x128xf32, #tpu.memory_space<vmem>>, vector<1x128xf32>
    %cst = arith.constant dense<0.000000e+00> : vector<6x16xf32>
    %3 = vector.multi_reduction <add>, %0, %cst [2] : vector<6x16x128xf32> to vector<6x16xf32>
    %4 = vector.shape_cast %3 : vector<6x16xf32> to vector<6x16x1xf32>
    %cst_6 = arith.constant 1.280000e+02 : f32
    %5 = vector.broadcast %cst_6 : f32 to vector<6x16x1xf32>
    %6 = arith.divf %4, %5 : vector<6x16x1xf32>
    %7 = vector.broadcast %6 : vector<6x16x1xf32> to vector<6x16x128xf32>
    %8 = arith.subf %0, %7 : vector<6x16x128xf32>
    %9 = arith.mulf %8, %8 : vector<6x16x128xf32>
    %cst_7 = arith.constant dense<0.000000e+00> : vector<6x16xf32>
    %10 = vector.multi_reduction <add>, %9, %cst_7 [2] : vector<6x16x128xf32> to vector<6x16xf32>
    %11 = vector.shape_cast %10 : vector<6x16xf32> to vector<6x16x1xf32>
    %cst_8 = arith.constant 1.280000e+02 : f32
    %12 = vector.broadcast %cst_8 : f32 to vector<6x16x1xf32>
    %13 = arith.divf %11, %12 : vector<6x16x1xf32>
    %14 = vector.broadcast %6 : vector<6x16x1xf32> to vector<6x16x128xf32>
    %15 = arith.subf %0, %14 : vector<6x16x128xf32>
    %cst_9 = arith.constant 9.99999996E-13 : f32
    %16 = vector.broadcast %cst_9 : f32 to vector<6x16x1xf32>
    %17 = arith.addf %13, %16 : vector<6x16x1xf32>
    %18 = math.rsqrt %17 : vector<6x16x1xf32>
    %19 = vector.broadcast %18 : vector<6x16x1xf32> to vector<6x16x128xf32>
    %20 = arith.mulf %15, %19 : vector<6x16x128xf32>
    %21 = vector.shape_cast %1 : vector<1x128xf32> to vector<1x1x128xf32>
    %22 = vector.broadcast %21 : vector<1x1x128xf32> to vector<6x16x128xf32>
    %23 = arith.mulf %20, %22 : vector<6x16x128xf32>
    %24 = vector.shape_cast %2 : vector<1x128xf32> to vector<1x1x128xf32>
    %25 = vector.broadcast %24 : vector<1x1x128xf32> to vector<6x16x128xf32>
    %26 = arith.addf %23, %25 : vector<6x16x128xf32>
    %c0_10 = arith.constant 0 : index
    %c0_11 = arith.constant 0 : index
    %c0_12 = arith.constant 0 : index
    %27 = vector.load %arg4[%c0_10, %c0_11, %c0_12] : memref<6x16x128xf32, #tpu.memory_space<vmem>>, vector<6x16x128xf32>
    tpu.vector_store %arg4[%c0_10, %c0_11, %c0_12], %26 {strides = array<i32>} : memref<6x16x128xf32, #tpu.memory_space<vmem>>, vector<6x16x128xf32>,
    return
  }
  func.func @transform_0(%arg0: i32) -> (i32, i32, i32) {
    %c0_i32 = arith.constant 0 : i32
    %c0_i32_0 = arith.constant 0 : i32
    %c0_i32_1 = arith.constant 0 : i32
    return %arg0, %c0_i32, %c0_i32_0 : i32, i32, i32
  }
  func.func @transform_1(%arg0: i32) -> (i32, i32) {
    %c0_i32 = arith.constant 0 : i32
    %c0_i32_0 = arith.constant 0 : i32
    %c0_i32_1 = arith.constant 0 : i32
    return %c0_i32, %c0_i32_0 : i32, i32
  }
  func.func @transform_2(%arg0: i32) -> (i32, i32) {
    %c0_i32 = arith.constant 0 : i32
    %c0_i32_0 = arith.constant 0 : i32
    %c0_i32_1 = arith.constant 0 : i32
    return %c0_i32, %c0_i32_0 : i32, i32
  }
  func.func @transform_3(%arg0: i32) -> (i32, i32, i32) {
    %c0_i32 = arith.constant 0 : i32
    %c0_i32_0 = arith.constant 0 : i32
    %c0_i32_1 = arith.constant 0 : i32
    return %arg0, %c0_i32, %c0_i32_0 : i32, i32, i32
  }
}

</mosaic_0001>

<bundles_post_ra>
// kernel: tpu_custom_call.1
= control target key start
LH: loop header
LB: loop body
LE: loop exit
PB: predicated region body
PF: predicated region fallthrough
CT: control target
= control target key end

     0   :  { %8 = vsyncpa [#allocation3], 0  ;;  %s445_s0 = inlined_call_operand.hbm [shape: f32[6,16,128], index: 0, kind: input, shape index: {}]   ;;  %s446_s1 = inlined_call_operand.vmem [shape: f32[1,128], index: 1, kind: input, shape index: {}]   ;;  %s447_s2 = inlined_call_operand.vmem [shape: f32[1,128], index: 2, kind: input, shape index: {}]   ;;  %s448_s3 = inlined_call_operand.hbm [shape: f32[6,16,128], index: 3, kind: output, shape index: {}]  }
   0x1   :  { %9 = vsyncpa [#allocation4], 0  ;;  %s315_s12 = smov [#allocation2]  }
   0x2   :  { %s15_s13 = sshll.u32 %s315_s12, 4  ;;  %s16_s13 = int_to_ptr.vmem [resolvable:$true] %s15_s13 }
   0x3   :  { %s279_s14 = scalar_lea.vmem %s16_s13, 1536  ;;  %p284_p1 = scmp.lt.s32.totalorder %s16_s13, %s16_s13 }
   0x4   :  { %p280_p0 = scmp.ne.s32.totalorder %s16_s13, %s279_s14  ;;  %p285_p2 = scmp.lt.s32.totalorder %s279_s14, %s279_s14 }
   0x6   :  { %p286_p3 = por %p285_p2, %p284_p1 }
   0x8   :  { %p287_p4 = pnand %p286_p3, %p280_p0 }
   0xa   :  { %290 = shalt.err (!%p287_p4)
}
   0xb   :  { %s316_s15 = smov 128   ;;  %s317_s16 = smov 8  }
   0xc   :  { %21 = dma.hbm_to_vmem [thread:$0]  %s445_s0, 1536, %s16_s13, [#allocation3], %s316_s15, %s316_s15, %s317_s16  }
   0xd   :  { %311 = dma.done.wait [#allocation3], 1536  }
   0xe   :  { %312 = vsyncadd [#allocation3], 4294965760  ;;  %v29_v0 = vld [vmem:[#allocation2] sm:$0xff]  ;;  %v31_v1 = vld [vmem:[#allocation2 + $0x10] sm:$0xff] }
   0xf   :  { %43 = vadd.xlane.f32.xlu0 %v29_v0  ;;  %47 = vadd.xlane.f32.xlu1 %v31_v1  ;;  %v30_v2 = vld [vmem:[#allocation2 + $0x8] sm:$0xff]  ;;  %v32_v3 = vld [vmem:[#allocation2 + $0x18] sm:$0xff]  ;;  %v33_v4 = vld [vmem:[#allocation2 + $0x20] sm:$0xff] }
  0x10   :  { %v34_v5 = vld [vmem:[#allocation2 + $0x28] sm:$0xff]  ;;  %v35_v6 = vld [vmem:[#allocation2 + $0x30] sm:$0xff]  ;;  %v36_v7 = vld [vmem:[#allocation2 + $0x38] sm:$0xff] }
  0x11   :  { %v37_v8 = vld [vmem:[#allocation2 + $0x40] sm:$0xff]  ;;  %v38_v9 = vld [vmem:[#allocation2 + $0x48] sm:$0xff]  ;;  %v39_v10 = vld [vmem:[#allocation2 + $0x50] sm:$0xff] }
  0x12   :  { %v40_v11 = vld [vmem:[#allocation2 + $0x58] sm:$0xff] }
  0x13   :  { %45 = vadd.xlane.f32.xlu0 %v30_v2  ;;  %49 = vadd.xlane.f32.xlu1 %v32_v3 }
  0x17   :  { %51 = vadd.xlane.f32.xlu0 %v33_v4  ;;  %53 = vadd.xlane.f32.xlu1 %v34_v5 }
  0x1b   :  { %55 = vadd.xlane.f32.xlu0 %v35_v6  ;;  %57 = vadd.xlane.f32.xlu1 %v36_v7 }
  0x1f   :  { %59 = vadd.xlane.f32.xlu0 %v37_v8  ;;  %61 = vadd.xlane.f32.xlu1 %v38_v9 }
  0x23   :  { %63 = vadd.xlane.f32.xlu0 %v39_v10  ;;  %65 = vadd.xlane.f32.xlu1 %v40_v11 }
  0x98   :  { %v44_v12 = vpop.xlane.xlu0 %43  ;;  %v48_v13 = vpop.xlane.xlu1 %47 }
  0x99   :  { %v68_v14 = vmul.f32 0.0078125, %v44_v12  ;;  %v70_v15 = vmul.f32 0.0078125, %v48_v13 }
  0x9b   :  { %v345_v16 = vsub.f32 %v29_v0, %v68_v14  ;;  %v347_v17 = vsub.f32 %v31_v1, %v70_v15 }
  0x9c   :  { %v46_v18 = vpop.xlane.xlu0 %45  ;;  %v50_v19 = vpop.xlane.xlu1 %49 }
  0x9d   :  { %v69_v20 = vmul.f32 0.0078125, %v46_v18  ;;  %v92_v21 = vmul.f32 %v345_v16, %v345_v16  ;;  %v71_v22 = vmul.f32 0.0078125, %v50_v19  ;;  %v94_v25 = vmul.f32 %v347_v17, %v347_v17 }
  0x9f   :  { %v351_v23 = vsub.f32 %v30_v2, %v69_v20  ;;  %104 = vadd.xlane.f32.xlu0 %v92_v21  ;;  %v353_v24 = vsub.f32 %v32_v3, %v71_v22 }
  0xa0   :  { %v52_v26 = vpop.xlane.xlu0 %51  ;;  %v54_v27 = vpop.xlane.xlu1 %53 }
  0xa1   :  { %v72_v28 = vmul.f32 0.0078125, %v52_v26  ;;  %v93_v29 = vmul.f32 %v351_v23, %v351_v23  ;;  %v73_v30 = vmul.f32 0.0078125, %v54_v27  ;;  %v95_v33 = vmul.f32 %v353_v24, %v353_v24  ;;  %v396_v26 = vld [vmem:[%s446_s1] ss:$0 sm:$0xff]  ;;  %s318_s1 = smov [#allocation5]  }
  0xa3   :  { %v359_v31 = vsub.f32 %v33_v4, %v72_v28  ;;  %108 = vadd.xlane.f32.xlu0 %v94_v25  ;;  %106 = vadd.xlane.f32.xlu1 %v93_v29  ;;  %v361_v32 = vsub.f32 %v34_v5, %v73_v30  ;;  %v402_v30 = vld [vmem:[%s447_s2] ss:$0 sm:$0xff]  ;;  %s229_s2 = sshll.u32 %s318_s1, 4  ;;  %s230_s2 = int_to_ptr.vmem [resolvable:$true] %s229_s2 }
  0xa4   :  { %v56_v34 = vpop.xlane.xlu0 %55  ;;  %v58_v35 = vpop.xlane.xlu1 %57  ;;  %s291_s22 = scalar_lea.vmem %s230_s2, 1536  ;;  %p296_p6 = scmp.lt.s32.totalorder %s230_s2, %s230_s2 }
  0xa5   :  { %v74_v36 = vmul.f32 0.0078125, %v56_v34  ;;  %v96_v37 = vmul.f32 %v359_v31, %v359_v31  ;;  %v75_v38 = vmul.f32 0.0078125, %v58_v35  ;;  %v97_v41 = vmul.f32 %v361_v32, %v361_v32  ;;  %p292_p5 = scmp.ne.s32.totalorder %s230_s2, %s291_s22  ;;  %p297_p7 = scmp.lt.s32.totalorder %s291_s22, %s291_s22 }
  0xa7   :  { %v367_v39 = vsub.f32 %v35_v6, %v74_v36  ;;  %110 = vadd.xlane.f32.xlu1 %v95_v33  ;;  %112 = vadd.xlane.f32.xlu0 %v96_v37  ;;  %v369_v40 = vsub.f32 %v36_v7, %v75_v38  ;;  %p298_p8 = por %p297_p7, %p296_p6 }
  0xa8   :  { %v60_v42 = vpop.xlane.xlu0 %59  ;;  %v62_v43 = vpop.xlane.xlu1 %61 }
  0xa9   :  { %v76_v44 = vmul.f32 0.0078125, %v60_v42  ;;  %v98_v45 = vmul.f32 %v367_v39, %v367_v39  ;;  %v77_v46 = vmul.f32 0.0078125, %v62_v43  ;;  %v99_v49 = vmul.f32 %v369_v40, %v369_v40  ;;  %p299_p9 = pnand %p298_p8, %p292_p5 }
  0xab   :  { %v375_v47 = vsub.f32 %v37_v8, %v76_v44  ;;  %114 = vadd.xlane.f32.xlu1 %v97_v41  ;;  %116 = vadd.xlane.f32.xlu0 %v98_v45  ;;  %v377_v48 = vsub.f32 %v38_v9, %v77_v46 }
  0xac   :  { %v64_v50 = vpop.xlane.xlu0 %63  ;;  %v66_v51 = vpop.xlane.xlu1 %65 }
  0xad   :  { %v78_v52 = vmul.f32 0.0078125, %v64_v50  ;;  %v100_v53 = vmul.f32 %v375_v47, %v375_v47  ;;  %v79_v54 = vmul.f32 0.0078125, %v66_v51  ;;  %v101_v57 = vmul.f32 %v377_v48, %v377_v48 }
  0xaf   :  { %v383_v55 = vsub.f32 %v39_v10, %v78_v52  ;;  %118 = vadd.xlane.f32.xlu1 %v99_v49  ;;  %120 = vadd.xlane.f32.xlu0 %v100_v53  ;;  %v385_v56 = vsub.f32 %v40_v11, %v79_v54 }
  0xb1   :  { %v102_v58 = vmul.f32 %v383_v55, %v383_v55  ;;  %v103_v59 = vmul.f32 %v385_v56, %v385_v56 }
  0xb3   :  { %122 = vadd.xlane.f32.xlu1 %v101_v57  ;;  %124 = vadd.xlane.f32.xlu0 %v102_v58 }
  0xb7   :  { %126 = vadd.xlane.f32.xlu1 %v103_v59 }
 0x128   :  { %v105_v60 = vpop.xlane.xlu0 %104 }
 0x129   :  { %v128_v61 = vmul.f32 0.0078125, %v105_v60 }
 0x12b   :  { %v140_v62 = vadd.f32 1e-12, %v128_v61 }
 0x12c   :  { %v107_v63 = vpop.xlane.xlu1 %106  ;;  %v109_v0 = vpop.xlane.xlu0 %108 }
 0x12d   :  { %247 = vrsqrt.f32 %v140_v62  ;;  %v129_v1 = vmul.f32 0.0078125, %v107_v63  ;;  %v130_v2 = vmul.f32 0.0078125, %v109_v0 }
 0x12f   :  { %v141_v3 = vadd.f32 1e-12, %v129_v1  ;;  %v142_v4 = vadd.f32 1e-12, %v130_v2 }
 0x130   :  { %v111_v5 = vpop.xlane.xlu1 %110  ;;  %v113_v6 = vpop.xlane.xlu0 %112 }
 0x131   :  { %249 = vrsqrt.f32 %v141_v3  ;;  %v131_v7 = vmul.f32 0.0078125, %v111_v5  ;;  %v132_v8 = vmul.f32 0.0078125, %v113_v6 }
 0x132   :  { %251 = vrsqrt.f32 %v142_v4 }
 0x133   :  { %v143_v9 = vadd.f32 1e-12, %v131_v7  ;;  %v144_v10 = vadd.f32 1e-12, %v132_v8 }
 0x134   :  { %v115_v11 = vpop.xlane.xlu1 %114  ;;  %v117_v12 = vpop.xlane.xlu0 %116 }
 0x135   :  { %253 = vrsqrt.f32 %v143_v9  ;;  %v133_v13 = vmul.f32 0.0078125, %v115_v11  ;;  %v134_v14 = vmul.f32 0.0078125, %v117_v12 }
 0x136   :  { %255 = vrsqrt.f32 %v144_v10 }
 0x137   :  { %v145_v15 = vadd.f32 1e-12, %v133_v13  ;;  %v146_v18 = vadd.f32 1e-12, %v134_v14 }
 0x138   :  { %v119_v19 = vpop.xlane.xlu1 %118  ;;  %v121_v20 = vpop.xlane.xlu0 %120 }
 0x139   :  { %257 = vrsqrt.f32 %v145_v15  ;;  %v135_v21 = vmul.f32 0.0078125, %v119_v19  ;;  %v136_v22 = vmul.f32 0.0078125, %v121_v20 }
 0x13a   :  { %v248_v25 = vpop.eup %247  ;;  %259 = vrsqrt.f32 %v146_v18 }
 0x13b   :  { %v164_v27 = vmul.f32 %v248_v25, %v345_v16  ;;  %v147_v28 = vadd.f32 1e-12, %v135_v21  ;;  %v148_v29 = vadd.f32 1e-12, %v136_v22 }
 0x13c   :  { %v123_v33 = vpop.xlane.xlu1 %122  ;;  %v125_v34 = vpop.xlane.xlu0 %124 }
 0x13d   :  { %v182_v35 = vmul.f32 %v396_v26, %v164_v27  ;;  %261 = vrsqrt.f32 %v147_v28  ;;  %v137_v36 = vmul.f32 0.0078125, %v123_v33  ;;  %v138_v37 = vmul.f32 0.0078125, %v125_v34 }
 0x13e   :  { %v250_v38 = vpop.eup %249  ;;  %263 = vrsqrt.f32 %v148_v29 }
 0x13f   :  { %v252_v41 = vpop.eup %251  ;;  %v200_v42 = vadd.f32 %v402_v30, %v182_v35  ;;  %v165_v16 = vmul.f32 %v250_v38, %v351_v23  ;;  %v149_v43 = vadd.f32 1e-12, %v137_v36  ;;  %v150_v44 = vadd.f32 1e-12, %v138_v37 }
 0x140   :  { %v166_v45 = vmul.f32 %v252_v41, %v347_v17  ;;  %v127_v46 = vpop.xlane.xlu1 %126 }
 0x141   :  { %212 = vst [vmem:[#allocation5] sm:$0xff] %v200_v42  ;;  %v183_v49 = vmul.f32 %v396_v26, %v165_v16  ;;  %265 = vrsqrt.f32 %v149_v43  ;;  %v139_v50 = vmul.f32 0.0078125, %v127_v46 }
 0x142   :  { %v254_v51 = vpop.eup %253  ;;  %v184_v52 = vmul.f32 %v396_v26, %v166_v45  ;;  %267 = vrsqrt.f32 %v150_v44 }
 0x143   :  { %v256_v53 = vpop.eup %255  ;;  %v201_v54 = vadd.f32 %v402_v30, %v183_v49  ;;  %v167_v57 = vmul.f32 %v254_v51, %v353_v24  ;;  %v151_v23 = vadd.f32 1e-12, %v139_v50 }
 0x144   :  { %v202_v58 = vadd.f32 %v402_v30, %v184_v52  ;;  %v168_v17 = vmul.f32 %v256_v53, %v359_v31 }
 0x145   :  { %213 = vst [vmem:[#allocation5 + $0x8] sm:$0xff] %v201_v54  ;;  %v185_v59 = vmul.f32 %v396_v26, %v167_v57  ;;  %269 = vrsqrt.f32 %v151_v23 }
 0x146   :  { %v258_v60 = vpop.eup %257  ;;  %214 = vst [vmem:[#allocation5 + $0x10] sm:$0xff] %v202_v58  ;;  %v186_v61 = vmul.f32 %v396_v26, %v168_v17 }
 0x147   :  { %v260_v62 = vpop.eup %259  ;;  %v203_v63 = vadd.f32 %v402_v30, %v185_v59  ;;  %v169_v0 = vmul.f32 %v258_v60, %v361_v32 }
 0x148   :  { %v204_v24 = vadd.f32 %v402_v30, %v186_v61  ;;  %v170_v1 = vmul.f32 %v260_v62, %v367_v39 }
 0x149   :  { %215 = vst [vmem:[#allocation5 + $0x18] sm:$0xff] %v203_v63  ;;  %v187_v31 = vmul.f32 %v396_v26, %v169_v0 }
 0x14a   :  { %v262_v2 = vpop.eup %261  ;;  %216 = vst [vmem:[#allocation5 + $0x20] sm:$0xff] %v204_v24  ;;  %v188_v3 = vmul.f32 %v396_v26, %v170_v1 }
 0x14b   :  { %v264_v4 = vpop.eup %263  ;;  %v205_v5 = vadd.f32 %v402_v30, %v187_v31  ;;  %v171_v6 = vmul.f32 %v262_v2, %v369_v40 }
 0x14c   :  { %v206_v7 = vadd.f32 %v402_v30, %v188_v3  ;;  %v172_v32 = vmul.f32 %v264_v4, %v375_v47 }
 0x14d   :  { %217 = vst [vmem:[#allocation5 + $0x28] sm:$0xff] %v205_v5  ;;  %v189_v8 = vmul.f32 %v396_v26, %v171_v6 }
 0x14e   :  { %v266_v39 = vpop.eup %265  ;;  %218 = vst [vmem:[#allocation5 + $0x30] sm:$0xff] %v206_v7  ;;  %v190_v9 = vmul.f32 %v396_v26, %v172_v32 }
 0x14f   :  { %v268_v10 = vpop.eup %267  ;;  %v207_v11 = vadd.f32 %v402_v30, %v189_v8  ;;  %v173_v12 = vmul.f32 %v266_v39, %v377_v48 }
 0x150   :  { %v208_v13 = vadd.f32 %v402_v30, %v190_v9  ;;  %v174_v40 = vmul.f32 %v268_v10, %v383_v55 }
 0x151   :  { %219 = vst [vmem:[#allocation5 + $0x38] sm:$0xff] %v207_v11  ;;  %v191_v14 = vmul.f32 %v396_v26, %v173_v12 }
 0x152   :  { %v270_v47 = vpop.eup %269  ;;  %220 = vst [vmem:[#allocation5 + $0x40] sm:$0xff] %v208_v13  ;;  %v192_v15 = vmul.f32 %v396_v26, %v174_v40 }
 0x153   :  { %v209_v18 = vadd.f32 %v402_v30, %v191_v14  ;;  %v175_v19 = vmul.f32 %v270_v47, %v385_v56 }
 0x154   :  { %v210_v20 = vadd.f32 %v402_v30, %v192_v15 }
 0x155   :  { %221 = vst [vmem:[#allocation5 + $0x48] sm:$0xff] %v209_v18  ;;  %v193_v48 = vmul.f32 %v396_v26, %v175_v19 }
 0x156   :  { %222 = vst [vmem:[#allocation5 + $0x50] sm:$0xff] %v210_v20 }
 0x157   :  { %v211_v55 = vadd.f32 %v402_v30, %v193_v48 }
 0x159   :  { %223 = vst [vmem:[#allocation5 + $0x58] sm:$0xff] %v211_v55 }
 0x15a   :  { %302 = shalt.err (!%p299_p9)
}
 0x15b   :  { %235 = dma.vmem_to_hbm [thread:$0]  %s230_s2, 1536, %s448_s3, [#allocation4], %s316_s15, %s316_s15, %s317_s16  }
 0x15c   :  { %313 = dma.done.wait [#allocation4], 1536  }
 0x15d   :  { %314 = vsyncadd [#allocation4], 4294965760 }
 0x15e   :  { %239 = vsyncpa [#allocation3], 1 }
 0x15f   :  { %240 = vsyncpa [#allocation4], 1 }

</bundles_post_ra>
